<compile_context>
chip_gen: v6e
topology: v6e:2x2x1
jax: 0.10.0
libtpu: 0.0.40
codegen_flags: <defaults>
</compile_context>

<pallas_src>
import jax
import jax.numpy as jnp
from jax.experimental import pallas as pl
from jax.experimental.pallas import tpu as pltpu


def _round_up(x, m):
    return (x + m - 1) // m * m


def _flight_rec_kernel(up_ref, fr_ref, wu_ref, bu_ref, wf_ref, bf_ref, out_ref):
    tb = up_ref.shape[0]

    # Two small MXU matmuls (the contraction dims are tiny; this kernel is
    # HBM-bandwidth bound on the activation reads, not MXU bound).
    u = jnp.dot(up_ref[...], wu_ref[...], preferred_element_type=jnp.float32) + bu_ref[...]
    f = jnp.dot(fr_ref[...], wf_ref[...], preferred_element_type=jnp.float32) + bf_ref[...]

    # Cosine-similarity epilogue: VPU elementwise + XLU lane reductions.
    dot_uf = jnp.sum(u * f, axis=-1)   # (tb,)
    nu2 = jnp.sum(u * u, axis=-1)      # (tb,)
    nf2 = jnp.sum(f * f, axis=-1)      # (tb,)

    # torch.nn.CosineSimilarity(dim=1, eps=1e-6):
    #   sum(u*f) / (max(||u||, eps) * max(||f||, eps))
    # On squared norms: max(sqrt(a), eps) == sqrt(max(a, eps**2)) -> one sqrt.
    eps2 = jnp.float32(1e-12)
    denom = jnp.sqrt(jnp.maximum(nu2, eps2) * jnp.maximum(nf2, eps2))
    # NOTE: pl.reciprocal(denom, approx=True) would move the divide to the EUP
    # slot but risks the 1e-5 reference tolerance; keep the exact divide.
    sim = dot_uf / denom

    # Lane-dense (1, tb) output slab (tb is a multiple of 128 -> unmasked vst).
    out_ref[...] = sim.reshape(1, tb)


def flight_recommendation(user_pref, flight_records, wu, bu, wf, bf, *, tb=512):
    B, Du = user_pref.shape
    _, Df = flight_records.shape
    H = wu.shape[1]

    up = user_pref.astype(jnp.float32)
    fr = flight_records.astype(jnp.float32)
    wu = wu.astype(jnp.float32)
    wf = wf.astype(jnp.float32)
    bu = bu.reshape(1, H).astype(jnp.float32)
    bf = bf.reshape(1, H).astype(jnp.float32)

    # Batch tiling: big, lane-dense tiles (multiple of 128) amortize the
    # ~0.35us per-grid-step overhead; pad batch only when it doesn't divide.
    tb = min(tb, _round_up(B, 128))
    Bp = _round_up(B, tb)
    if Bp != B:
        pad = ((0, Bp - B), (0, 0))
        up = jnp.pad(up, pad)
        fr = jnp.pad(fr, pad)

    out = pl.pallas_call(
        _flight_rec_kernel,
        out_shape=jax.ShapeDtypeStruct((1, Bp), jnp.float32),
        grid_spec=pltpu.PrefetchScalarGridSpec(
            num_scalar_prefetch=0,
            grid=(Bp // tb,),
            in_specs=[
                pl.BlockSpec((tb, Du), lambda i: (i, 0)),   # user_pref: batch-tiled
                pl.BlockSpec((tb, Df), lambda i: (i, 0)),   # flight_records: batch-tiled
                pl.BlockSpec((Du, H), lambda i: (0, 0)),    # wu: VMEM-resident
                pl.BlockSpec((1, H), lambda i: (0, 0)),     # bu: VMEM-resident
                pl.BlockSpec((Df, H), lambda i: (0, 0)),    # wf: VMEM-resident
                pl.BlockSpec((1, H), lambda i: (0, 0)),     # bf: VMEM-resident
            ],
            out_specs=pl.BlockSpec((1, tb), lambda i: (0, i)),
        ),
        compiler_params=pltpu.CompilerParams(
            # Batch axis is embarrassingly parallel -> uses both TCs on v7x.
            dimension_semantics=("parallel",),
            # Well under v7x's 64 MiB physical VMEM (guardrail if dims grow).
            vmem_limit_bytes=32 << 20,
        ),
    )(up, fr, wu, bu, wf, bf)
    return out[0, :B]  # (B,)


def _ref_forward(user_pref, flight_records, wu, bu, wf, bf):
    u = user_pref @ wu + bu
    f = flight_records @ wf + bf
    eps = 1e-6
    dot = jnp.sum(u * f, axis=1)
    nu = jnp.maximum(jnp.linalg.norm(u, axis=1), eps)
    nf = jnp.maximum(jnp.linalg.norm(f, axis=1), eps)
    return dot / (nu * nf)


if __name__ == "__main__":
    # Small shapes consistent with the module
    B = 8                       # batch
    user_pref_input_dim = 16
    flight_records_input_dim = 32
    hidden_dim = 32

    key = jax.random.PRNGKey(0)
    k1, k2, k3, k4, k5, k6 = jax.random.split(key, 6)

    # Deterministic parameter init (uniform like PyTorch Linear default ranges).
    bound_u = 1.0 / (user_pref_input_dim ** 0.5)
    bound_f = 1.0 / (flight_records_input_dim ** 0.5)
    wu = jax.random.uniform(k1, (user_pref_input_dim, hidden_dim),
                            jnp.float32, -bound_u, bound_u)
    bu = jax.random.uniform(k2, (1, hidden_dim), jnp.float32, -bound_u, bound_u)
    wf = jax.random.uniform(k3, (flight_records_input_dim, hidden_dim),
                            jnp.float32, -bound_f, bound_f)
    bf = jax.random.uniform(k4, (1, hidden_dim), jnp.float32, -bound_f, bound_f)

    user_pref = jax.random.normal(k5, (B, user_pref_input_dim), jnp.float32)
    flight_records = jax.random.normal(k6, (B, flight_records_input_dim), jnp.float32)

    sim = flight_recommendation(user_pref, flight_records, wu, bu, wf, bf)
    jax.block_until_ready(sim)

    ref = _ref_forward(user_pref, flight_records, wu, bu, wf, bf)
    assert sim.shape == (B,)
    assert jnp.allclose(sim, ref, atol=1e-5, rtol=1e-5)

    print("KERNEL_OK")
</pallas_src>

<mosaic_0001>
module attributes {stable_mosaic.version = 11 : i64} {
  func.func @_flight_rec_kernel(%arg0: i32, %arg1: memref<128x16xf32, #tpu.memory_space<vmem>>, %arg2: memref<128x32xf32, #tpu.memory_space<vmem>>, %arg3: memref<16x32xf32, #tpu.memory_space<vmem>>, %arg4: memref<1x32xf32, #tpu.memory_space<vmem>>, %arg5: memref<32x32xf32, #tpu.memory_space<vmem>>, %arg6: memref<1x32xf32, #tpu.memory_space<vmem>>, %arg7: memref<1x128xf32, #tpu.memory_space<vmem>>) attributes {dimension_semantics = [#tpu.dimension_semantics<parallel>], iteration_bounds = array<i64: 1>, scalar_prefetch = 0 : i64, scratch_operands = 0 : i64, tpu.core_type = #tpu.core_type<tc>, window_params = [{transform_indices = @transform_0, window_bounds = array<i64: 128, 16>}, {transform_indices = @transform_1, window_bounds = array<i64: 128, 32>}, {pipeline_mode = #tpu.pipeline_mode<synchronous>, transform_indices = @transform_2, window_bounds = array<i64: 16, 32>}, {pipeline_mode = #tpu.pipeline_mode<synchronous>, transform_indices = @transform_3, window_bounds = array<i64: 1, 32>}, {pipeline_mode = #tpu.pipeline_mode<synchronous>, transform_indices = @transform_4, window_bounds = array<i64: 32, 32>}, {pipeline_mode = #tpu.pipeline_mode<synchronous>, transform_indices = @transform_5, window_bounds = array<i64: 1, 32>}, {transform_indices = @transform_6, window_bounds = array<i64: 1, 128>}]} {
    %c0 = arith.constant 0 : index
    %c0_0 = arith.constant 0 : index
    %0 = vector.load %arg1[%c0, %c0_0] : memref<128x16xf32, #tpu.memory_space<vmem>>, vector<128x16xf32>
    %c0_1 = arith.constant 0 : index
    %c0_2 = arith.constant 0 : index
    %1 = vector.load %arg3[%c0_1, %c0_2] : memref<16x32xf32, #tpu.memory_space<vmem>>, vector<16x32xf32>
    %cst = arith.constant dense<0.000000e+00> : vector<128x32xf32>
    %2 = tpu.matmul %0, %1, %cst {dimension_numbers = #tpu.dot_dimension_numbers<[1], [0], [0], [1], [0, 0, 1, 1], [], []>} : vector<128x16xf32>, vector<16x32xf32>, vector<128x32xf32> -> vector<128x32xf32>
    %c0_3 = arith.constant 0 : index
    %c0_4 = arith.constant 0 : index
    %3 = vector.load %arg4[%c0_3, %c0_4] : memref<1x32xf32, #tpu.memory_space<vmem>>, vector<1x32xf32>
    %4 = vector.broadcast %3 : vector<1x32xf32> to vector<128x32xf32>
    %5 = arith.addf %2, %4 : vector<128x32xf32>
    %c0_5 = arith.constant 0 : index
    %c0_6 = arith.constant 0 : index
    %6 = vector.load %arg2[%c0_5, %c0_6] : memref<128x32xf32, #tpu.memory_space<vmem>>, vector<128x32xf32>
    %c0_7 = arith.constant 0 : index
    %c0_8 = arith.constant 0 : index
    %7 = vector.load %arg5[%c0_7, %c0_8] : memref<32x32xf32, #tpu.memory_space<vmem>>, vector<32x32xf32>
    %cst_9 = arith.constant dense<0.000000e+00> : vector<128x32xf32>
    %8 = tpu.matmul %6, %7, %cst_9 {dimension_numbers = #tpu.dot_dimension_numbers<[1], [0], [0], [1], [0, 0, 1, 1], [], []>} : vector<128x32xf32>, vector<32x32xf32>, vector<128x32xf32> -> vector<128x32xf32>
    %c0_10 = arith.constant 0 : index
    %c0_11 = arith.constant 0 : index
    %9 = vector.load %arg6[%c0_10, %c0_11] : memref<1x32xf32, #tpu.memory_space<vmem>>, vector<1x32xf32>
    %10 = vector.broadcast %9 : vector<1x32xf32> to vector<128x32xf32>
    %11 = arith.addf %8, %10 : vector<128x32xf32>
    %12 = arith.mulf %5, %11 : vector<128x32xf32>
    %cst_12 = arith.constant dense<0.000000e+00> : vector<128xf32>
    %13 = vector.multi_reduction <add>, %12, %cst_12 [1] : vector<128x32xf32> to vector<128xf32>
    %14 = arith.mulf %5, %5 : vector<128x32xf32>
    %cst_13 = arith.constant dense<0.000000e+00> : vector<128xf32>
    %15 = vector.multi_reduction <add>, %14, %cst_13 [1] : vector<128x32xf32> to vector<128xf32>
    %16 = arith.mulf %11, %11 : vector<128x32xf32>
    %cst_14 = arith.constant dense<0.000000e+00> : vector<128xf32>
    %17 = vector.multi_reduction <add>, %16, %cst_14 [1] : vector<128x32xf32> to vector<128xf32>
    %cst_15 = arith.constant 9.99999996E-13 : f32
    %18 = vector.broadcast %cst_15 : f32 to vector<128xf32>
    %19 = arith.maximumf %15, %18 : vector<128xf32>
    %cst_16 = arith.constant 9.99999996E-13 : f32
    %20 = vector.broadcast %cst_16 : f32 to vector<128xf32>
    %21 = arith.maximumf %17, %20 : vector<128xf32>
    %22 = arith.mulf %19, %21 : vector<128xf32>
    %23 = math.sqrt %22 : vector<128xf32>
    %24 = arith.divf %13, %23 : vector<128xf32>
    %25 = vector.shape_cast %24 : vector<128xf32> to vector<1x128xf32>
    %c0_17 = arith.constant 0 : index
    %c0_18 = arith.constant 0 : index
    %26 = vector.load %arg7[%c0_17, %c0_18] : memref<1x128xf32, #tpu.memory_space<vmem>>, vector<1x128xf32>
    tpu.vector_store %arg7[%c0_17, %c0_18], %25 {strides = array<i32>} : memref<1x128xf32, #tpu.memory_space<vmem>>, vector<1x128xf32>,
    return
  }
  func.func @transform_0(%arg0: i32) -> (i32, i32) {
    %c0_i32 = arith.constant 0 : i32
    %c0_i32_0 = arith.constant 0 : i32
    return %arg0, %c0_i32 : i32, i32
  }
  func.func @transform_1(%arg0: i32) -> (i32, i32) {
    %c0_i32 = arith.constant 0 : i32
    %c0_i32_0 = arith.constant 0 : i32
    return %arg0, %c0_i32 : i32, i32
  }
  func.func @transform_2(%arg0: i32) -> (i32, i32) {
    %c0_i32 = arith.constant 0 : i32
    %c0_i32_0 = arith.constant 0 : i32
    %c0_i32_1 = arith.constant 0 : i32
    return %c0_i32, %c0_i32_0 : i32, i32
  }
  func.func @transform_3(%arg0: i32) -> (i32, i32) {
    %c0_i32 = arith.constant 0 : i32
    %c0_i32_0 = arith.constant 0 : i32
    %c0_i32_1 = arith.constant 0 : i32
    return %c0_i32, %c0_i32_0 : i32, i32
  }
  func.func @transform_4(%arg0: i32) -> (i32, i32) {
    %c0_i32 = arith.constant 0 : i32
    %c0_i32_0 = arith.constant 0 : i32
    %c0_i32_1 = arith.constant 0 : i32
    return %c0_i32, %c0_i32_0 : i32, i32
  }
  func.func @transform_5(%arg0: i32) -> (i32, i32) {
    %c0_i32 = arith.constant 0 : i32
    %c0_i32_0 = arith.constant 0 : i32
    %c0_i32_1 = arith.constant 0 : i32
    return %c0_i32, %c0_i32_0 : i32, i32
  }
  func.func @transform_6(%arg0: i32) -> (i32, i32) {
    %c0_i32 = arith.constant 0 : i32
    %c0_i32_0 = arith.constant 0 : i32
    return %c0_i32, %arg0 : i32, i32
  }
}

</mosaic_0001>

<bundles_post_ra>
// kernel: tpu_custom_call.1
= control target key start
LH: loop header
LB: loop body
LE: loop exit
PB: predicated region body
PF: predicated region fallthrough
CT: control target
= control target key end

     0   :  { %vm49_vm0 = vcmask 130048   ;;  %vm270_vm1 = vcmask 261120   ;;  %s1858_s0 = inlined_call_operand.vmem [shape: f32[128,16], index: 0, kind: input, shape index: {}]   ;;  %s1859_s1 = inlined_call_operand.vmem [shape: f32[128,32], index: 1, kind: input, shape index: {}]   ;;  %s1860_s2 = inlined_call_operand.vmem [shape: f32[16,32], index: 2, kind: input, shape index: {}]   ;;  %s1861_s3 = inlined_call_operand.vmem [shape: f32[1,32], index: 3, kind: input, shape index: {}]   ;;  %s1862_s4 = inlined_call_operand.vmem [shape: f32[32,32], index: 4, kind: input, shape index: {}]   ;;  %s1863_s5 = inlined_call_operand.vmem [shape: f32[1,32], index: 5, kind: input, shape index: {}]   ;;  %s1864_s6 = inlined_call_operand.hbm [shape: f32[1,128], index: 6, kind: output, shape index: {}]  }
   0x1   :  { %v41_v0 = vld [vmem:[%s1860_s2 + $0x8] sm:$0xff]  ;;  %v262_v1 = vld [vmem:[%s1862_s4 + $0x18] sm:$0xff]  ;;  %v40_v2 = vld [vmem:[%s1860_s2] sm:$0xff] }
   0x2   :  { %1063 = vmatprep.subr.mxu0 %v41_v0  ;;  %1091 = vmatprep.subr.mxu1 %v262_v1  ;;  %v261_v3 = vld [vmem:[%s1862_s4 + $0x10] sm:$0xff]  ;;  %v24_v4 = vld [vmem:[%s1858_s0] sm:$0xff]  ;;  %v25_v5 = vld [vmem:[%s1858_s0 + $0x8] sm:$0xff] }
   0x3   :  { %1064 = vmatpush3.msra.mxu0 %v41_v0  ;;  %1092 = vmatpush3.msra.mxu1 %v262_v1  ;;  %v260_v6 = vld [vmem:[%s1862_s4 + $0x8] sm:$0xff]  ;;  %v243_v7 = vld [vmem:[%s1859_s1] sm:$0xff]  ;;  %v26_v8 = vld [vmem:[%s1858_s0 + $0x10] sm:$0xff] }
   0x4   :  { %1065 = vmatprep.subr.mxu0 %v40_v2  ;;  %1093 = vmatprep.subr.mxu1 %v261_v3  ;;  %v259_v9 = vld [vmem:[%s1862_s4] sm:$0xff]  ;;  %v27_v10 = vld [vmem:[%s1858_s0 + $0x18] sm:$0xff]  ;;  %v244_v11 = vld [vmem:[%s1859_s1 + $0x8] sm:$0xff] }
   0x5   :  { %1066 = vmatpush3.msra.mxu0 %v40_v2  ;;  %1067 = vmatprep.mubr.msk.f32.mxu0 %vm49_vm0, %v24_v4  ;;  %v28_v12 = vld [vmem:[%s1858_s0 + $0x20] sm:$0xff]  ;;  %v245_v13 = vld [vmem:[%s1859_s1 + $0x10] sm:$0xff]  ;;  %v29_v14 = vld [vmem:[%s1858_s0 + $0x28] sm:$0xff] }
   0x6   :  { %1094 = vmatpush3.msra.mxu1 %v261_v3  ;;  %1068 = vmatmul.mubr.msk.f32.vlgmr.msra.gmra.mxu0 %vm49_vm0, %v25_v5  ;;  %v246_v15 = vld [vmem:[%s1859_s1 + $0x18] sm:$0xff]  ;;  %v30_v16 = vld [vmem:[%s1858_s0 + $0x30] sm:$0xff]  ;;  %v247_v17 = vld [vmem:[%s1859_s1 + $0x20] sm:$0xff] }
   0x7   :  { %1095 = vmatprep.subr.mxu1 %v260_v6  ;;  %1099 = vmatprep.mubr.msk.f32.mxu1 %vm270_vm1, %v243_v7 }
   0x8   :  { %1096 = vmatpush3.msra.mxu1 %v260_v6  ;;  %1070 = vmatprep.mubr.msk.f32.mxu0 %vm49_vm0, %v26_v8 }
   0x9   :  { %1097 = vmatprep.subr.mxu1 %v259_v9 }
   0xa   :  { %1098 = vmatpush3.msra.mxu1 %v259_v9  ;;  %1071 = vmatmul.mubr.msk.f32.gmra.mxu0 %vm49_vm0, %v27_v10 }
   0xb   :  { %1100 = vmatmul.mubr.msk.f32.vlgmr.msra.gmra.mxu1 %vm270_vm1, %v244_v11  ;;  %1073 = vmatprep.mubr.msk.f32.mxu0 %vm49_vm0, %v28_v12 }
   0xc   :  { %1102 = vmatprep.mubr.msk.f32.mxu1 %vm270_vm1, %v245_v13 }
   0xd   :  { %11 = vsyncpa [#allocation3], 0  ;;  %v31_v18 = vld [vmem:[%s1858_s0 + $0x38] sm:$0xff]  ;;  %v248_v19 = vld [vmem:[%s1859_s1 + $0x28] sm:$0xff] }
   0xe   :  { %1074 = vmatmul.mubr.msk.f32.gmra.mxu0 %vm49_vm0, %v29_v14  ;;  %v32_v20 = vld [vmem:[%s1858_s0 + $0x40] sm:$0xff]  ;;  %v249_v21 = vld [vmem:[%s1859_s1 + $0x30] sm:$0xff]  ;;  %v33_v22 = vld [vmem:[%s1858_s0 + $0x48] sm:$0xff] }
   0xf   :  { %1103 = vmatmul.mubr.msk.f32.gmra.mxu1 %vm270_vm1, %v246_v15  ;;  %1076 = vmatprep.mubr.msk.f32.mxu0 %vm49_vm0, %v30_v16  ;;  %v250_v23 = vld [vmem:[%s1859_s1 + $0x38] sm:$0xff]  ;;  %v34_v24 = vld [vmem:[%s1858_s0 + $0x50] sm:$0xff]  ;;  %v251_v25 = vld [vmem:[%s1859_s1 + $0x40] sm:$0xff] }
  0x10   :  { %1105 = vmatprep.mubr.msk.f32.mxu1 %vm270_vm1, %v247_v17  ;;  %v35_v26 = vld [vmem:[%s1858_s0 + $0x58] sm:$0xff]  ;;  %v252_v27 = vld [vmem:[%s1859_s1 + $0x48] sm:$0xff]  ;;  %v36_v28 = vld [vmem:[%s1858_s0 + $0x60] sm:$0xff] }
  0x11   :  { %v253_v29 = vld [vmem:[%s1859_s1 + $0x50] sm:$0xff]  ;;  %v37_v30 = vld [vmem:[%s1858_s0 + $0x68] sm:$0xff]  ;;  %v254_v31 = vld [vmem:[%s1859_s1 + $0x58] sm:$0xff] }
  0x12   :  { %1077 = vmatmul.mubr.msk.f32.gmra.mxu0 %vm49_vm0, %v31_v18  ;;  %v38_v32 = vld [vmem:[%s1858_s0 + $0x70] sm:$0xff]  ;;  %v255_v33 = vld [vmem:[%s1859_s1 + $0x60] sm:$0xff]  ;;  %v39_v34 = vld [vmem:[%s1858_s0 + $0x78] sm:$0xff] }
  0x13   :  { %1106 = vmatmul.mubr.msk.f32.gmra.mxu1 %vm270_vm1, %v248_v19  ;;  %1079 = vmatprep.mubr.msk.f32.mxu0 %vm49_vm0, %v32_v20  ;;  %v256_v35 = vld [vmem:[%s1859_s1 + $0x68] sm:$0xff]  ;;  %v257_v36 = vld [vmem:[%s1859_s1 + $0x70] sm:$0xff]  ;;  %v258_v37 = vld [vmem:[%s1859_s1 + $0x78] sm:$0xff]  ;;  %s1210_s1 = smov [#allocation2]  }
  0x14   :  { %1108 = vmatprep.mubr.msk.f32.mxu1 %vm270_vm1, %v249_v21  ;;  %v1395_v38 = vld [vmem:[%s1861_s3] ss:$0 sm:$0xff]  ;;  %s983_s3 = sshll.u32 %s1210_s1, 4  ;;  %s984_s3 = int_to_ptr.vmem [resolvable:$true] %s983_s3 }
  0x15   :  { %v1404_v43 = vld [vmem:[%s1863_s5] ss:$0 sm:$0xff]  ;;  %s1188_s5 = scalar_lea.vmem %s984_s3, 16  ;;  %s1192_s22 = scalar_lea.vmem %s984_s3, 32 }
  0x16   :  { %1080 = vmatmul.mubr.msk.f32.gmra.mxu0 %vm49_vm0, %v33_v22  ;;  %p1189_p0 = scmp.ne.s32.totalorder %s984_s3, %s1188_s5  ;;  %p1193_p1 = scmp.lt.s32.totalorder %s984_s3, %s984_s3 }
  0x17   :  { %1109 = vmatmul.mubr.msk.f32.gmra.mxu1 %vm270_vm1, %v250_v23  ;;  %1082 = vmatprep.mubr.msk.f32.mxu0 %vm49_vm0, %v34_v24  ;;  %p1194_p2 = scmp.lt.s32.totalorder %s1192_s22, %s1188_s5 }
  0x18   :  { %1111 = vmatprep.mubr.msk.f32.mxu1 %vm270_vm1, %v251_v25 }
  0x19   :  { %p1195_p3 = por %p1194_p2, %p1193_p1 }
  0x1a   :  { %1083 = vmatmul.mubr.msk.f32.gmra.mxu0 %vm49_vm0, %v35_v26 }
  0x1b   :  { %1112 = vmatmul.mubr.msk.f32.gmra.mxu1 %vm270_vm1, %v252_v27  ;;  %1085 = vmatprep.mubr.msk.f32.mxu0 %vm49_vm0, %v36_v28  ;;  %p1196_p4 = pnand %p1195_p3, %p1189_p0 }
  0x1c   :  { %1114 = vmatprep.mubr.msk.f32.mxu1 %vm270_vm1, %v253_v29 }
  0x1e   :  { %1086 = vmatmul.mubr.msk.f32.gmra.mxu0 %vm49_vm0, %v37_v30 }
  0x1f   :  { %1115 = vmatmul.mubr.msk.f32.gmra.mxu1 %vm270_vm1, %v254_v31  ;;  %1088 = vmatprep.mubr.msk.f32.mxu0 %vm49_vm0, %v38_v32 }
  0x20   :  { %1117 = vmatprep.mubr.msk.f32.mxu1 %vm270_vm1, %v255_v33 }
  0x22   :  { %1089 = vmatmul.mubr.msk.f32.gmra.mxu0 %vm49_vm0, %v39_v34 }
  0x23   :  { %1118 = vmatmul.mubr.msk.f32.gmra.mxu1 %vm270_vm1, %v256_v35 }
  0x24   :  { %1120 = vmatprep.mubr.msk.f32.mxu1 %vm270_vm1, %v257_v36 }
  0x27   :  { %1121 = vmatmul.mubr.msk.f32.gmra.mxu1 %vm270_vm1, %v258_v37 }
  0xc6   :  { %v1069_v39 = vpop.f32.mrf.mxu0 }
  0xc7   :  { %v170_v40 = vadd.f32 %v1069_v39, %v1395_v38 }
  0xc8   :  { %v164_v41 = vpop.f32.mrf.mxu0 }
  0xc9   :  { %v1399_v42 = vadd.f32 %v1395_v38, %v164_v41  ;;  %v529_v44 = vmul.f32 %v170_v40, %v170_v40 }
  0xca   :  { %v1072_v45 = vpop.f32.mrf.mxu0 }
  0xcb   :  { %v1101_v46 = vpop.f32.mrf.mxu1  ;;  %v547_v47 = vsel %vm270_vm1, %v529_v44, 0.0  ;;  %v1408_v48 = vadd.f32 %v1072_v45, %v1395_v38  ;;  %v528_v49 = vmul.f32 %v1399_v42, %v1399_v42 }
  0xcc   :  { %v391_v50 = vadd.f32 %v1101_v46, %v1404_v43  ;;  %548 = vadd.xlane.f32.xlu0 %v547_v47  ;;  %v174_v51 = vpop.f32.mrf.mxu0 }
  0xcd   :  { %v385_v52 = vpop.f32.mrf.mxu1  ;;  %v544_v53 = vsel %vm270_vm1, %v528_v49, 0.0  ;;  %v1415_v54 = vadd.f32 %v1395_v38, %v174_v51  ;;  %v531_v55 = vmul.f32 %v1408_v48, %v1408_v48 }
  0xce   :  { %v1420_v56 = vadd.f32 %v1404_v43, %v385_v52  ;;  %v593_v57 = vmul.f32 %v391_v50, %v391_v50  ;;  %v1075_v58 = vpop.f32.mrf.mxu0  ;;  %v1422_v59 = vmul.f32 %v391_v50, %v170_v40 }
  0xcf   :  { %v1104_v60 = vpop.f32.mrf.mxu1  ;;  %v553_v1 = vsel %vm270_vm1, %v531_v55, 0.0  ;;  %v1432_v2 = vadd.f32 %v1075_v58, %v1395_v38  ;;  %v530_v3 = vmul.f32 %v1415_v54, %v1415_v54 }
  0xd0   :  { %v611_v61 = vsel %vm270_vm1, %v593_v57, 0.0  ;;  %v1426_v62 = vadd.f32 %v1104_v60, %v1404_v43  ;;  %545 = vadd.xlane.f32.xlu0 %v544_v53  ;;  %v592_v63 = vmul.f32 %v1420_v56, %v1420_v56  ;;  %v184_v5 = vpop.f32.mrf.mxu0 }
  0xd1   :  { %612 = vadd.xlane.f32.xlu1 %v611_v61  ;;  %v395_v0 = vpop.f32.mrf.mxu1  ;;  %v550_v9 = vsel %vm270_vm1, %v530_v3, 0.0  ;;  %v1444_v10 = vadd.f32 %v1395_v38, %v184_v5  ;;  %v533_v11 = vmul.f32 %v1432_v2, %v1432_v2 }
  0xd2   :  { %v595_v4 = vmul.f32 %v1426_v62, %v1426_v62  ;;  %v1439_v6 = vadd.f32 %v1404_v43, %v395_v0  ;;  %v608_v7 = vsel %vm270_vm1, %v592_v63, 0.0  ;;  %v1078_v14 = vpop.f32.mrf.mxu0 }
  0xd3   :  { %v1107_v8 = vpop.f32.mrf.mxu1  ;;  %v559_v17 = vsel %vm270_vm1, %v533_v11, 0.0  ;;  %v1456_v18 = vadd.f32 %v1078_v14, %v1395_v38  ;;  %v532_v19 = vmul.f32 %v1444_v10, %v1444_v10 }
  0xd4   :  { %554 = vadd.xlane.f32.xlu0 %v553_v1  ;;  %v1449_v12 = vadd.f32 %v1107_v8, %v1404_v43  ;;  %v617_v13 = vsel %vm270_vm1, %v595_v4, 0.0  ;;  %v594_v15 = vmul.f32 %v1439_v6, %v1439_v6  ;;  %v194_v21 = vpop.f32.mrf.mxu0 }
  0xd5   :  { %609 = vadd.xlane.f32.xlu1 %v608_v7  ;;  %v405_v16 = vpop.f32.mrf.mxu1  ;;  %v556_v25 = vsel %vm270_vm1, %v532_v19, 0.0  ;;  %v1468_v26 = vadd.f32 %v1395_v38, %v194_v21  ;;  %v535_v27 = vmul.f32 %v1456_v18, %v1456_v18 }
  0xd6   :  { %v597_v20 = vmul.f32 %v1449_v12, %v1449_v12  ;;  %v1463_v22 = vadd.f32 %v1404_v43, %v405_v16  ;;  %v614_v23 = vsel %vm270_vm1, %v594_v15, 0.0  ;;  %v1081_v30 = vpop.f32.mrf.mxu0 }
  0xd7   :  { %v1110_v24 = vpop.f32.mrf.mxu1  ;;  %v565_v33 = vsel %vm270_vm1, %v535_v27, 0.0  ;;  %v1480_v34 = vadd.f32 %v1081_v30, %v1395_v38  ;;  %v534_v35 = vmul.f32 %v1468_v26, %v1468_v26 }
  0xd8   :  { %551 = vadd.xlane.f32.xlu0 %v550_v9  ;;  %v1473_v28 = vadd.f32 %v1110_v24, %v1404_v43  ;;  %v623_v29 = vsel %vm270_vm1, %v597_v20, 0.0  ;;  %v596_v31 = vmul.f32 %v1463_v22, %v1463_v22  ;;  %v204_v37 = vpop.f32.mrf.mxu0 }
  0xd9   :  { %618 = vadd.xlane.f32.xlu1 %v617_v13  ;;  %v415_v32 = vpop.f32.mrf.mxu1  ;;  %v562_v44 = vsel %vm270_vm1, %v534_v35, 0.0  ;;  %v1492_v45 = vadd.f32 %v1395_v38, %v204_v37  ;;  %v537_v46 = vmul.f32 %v1480_v34, %v1480_v34 }
  0xda   :  { %v599_v36 = vmul.f32 %v1473_v28, %v1473_v28  ;;  %v1487_v39 = vadd.f32 %v1404_v43, %v415_v32  ;;  %v620_v40 = vsel %vm270_vm1, %v596_v31, 0.0  ;;  %v1084_v50 = vpop.f32.mrf.mxu0 }
  0xdb   :  { %v1113_v41 = vpop.f32.mrf.mxu1  ;;  %v571_v53 = vsel %vm270_vm1, %v537_v46, 0.0  ;;  %v1504_v55 = vadd.f32 %v1084_v50, %v1395_v38  ;;  %v536_v57 = vmul.f32 %v1492_v45, %v1492_v45 }
  0xdc   :  { %560 = vadd.xlane.f32.xlu0 %v559_v17  ;;  %v1497_v47 = vadd.f32 %v1113_v41, %v1404_v43  ;;  %v629_v49 = vsel %vm270_vm1, %v599_v36, 0.0  ;;  %v598_v51 = vmul.f32 %v1487_v39, %v1487_v39  ;;  %v214_v60 = vpop.f32.mrf.mxu0 }
  0xdd   :  { %615 = vadd.xlane.f32.xlu1 %v614_v23  ;;  %v425_v52 = vpop.f32.mrf.mxu1  ;;  %v568_v3 = vsel %vm270_vm1, %v536_v57, 0.0  ;;  %v1516_v4 = vadd.f32 %v1395_v38, %v214_v60  ;;  %v539_v5 = vmul.f32 %v1504_v55, %v1504_v55 }
  0xde   :  { %v601_v58 = vmul.f32 %v1497_v47, %v1497_v47  ;;  %v1511_v61 = vadd.f32 %v1404_v43, %v425_v52  ;;  %v626_v63 = vsel %vm270_vm1, %v598_v51, 0.0  ;;  %v1087_v0 = vpop.f32.mrf.mxu0 }
  0xdf   :  { %v1116_v1 = vpop.f32.mrf.mxu1  ;;  %v577_v14 = vsel %vm270_vm1, %v539_v5, 0.0  ;;  %v1528_v15 = vadd.f32 %v1087_v0, %v1395_v38  ;;  %v538_v16 = vmul.f32 %v1516_v4, %v1516_v4 }
  0xe0   :  { %557 = vadd.xlane.f32.xlu0 %v556_v25  ;;  %v1521_v7 = vadd.f32 %v1116_v1, %v1404_v43  ;;  %v635_v8 = vsel %vm270_vm1, %v601_v58, 0.0  ;;  %v224_v9 = vpop.f32.mrf.mxu0  ;;  %v600_v11 = vmul.f32 %v1511_v61, %v1511_v61 }
  0xe1   :  { %624 = vadd.xlane.f32.xlu1 %v623_v29  ;;  %v435_v13 = vpop.f32.mrf.mxu1  ;;  %v574_v24 = vsel %vm270_vm1, %v538_v16, 0.0  ;;  %v1540_v25 = vadd.f32 %v1395_v38, %v224_v9  ;;  %v541_v27 = vmul.f32 %v1528_v15, %v1528_v15  ;;  %v468_v16 = vmul.f32 %v1463_v22, %v1444_v10 }
  0xe2   :  { %v603_v17 = vmul.f32 %v1521_v7, %v1521_v7  ;;  %v1090_v19 = vpop.f32.mrf.mxu0  ;;  %v1535_v21 = vadd.f32 %v1404_v43, %v435_v13  ;;  %v632_v23 = vsel %vm270_vm1, %v600_v11, 0.0 }
  0xe3   :  { %v1119_v20 = vpop.f32.mrf.mxu1  ;;  %v583_v35 = vsel %vm270_vm1, %v541_v27, 0.0 }
  0xe4   :  { %566 = vadd.xlane.f32.xlu0 %v565_v33  ;;  %v1545_v29 = vadd.f32 %v1119_v20, %v1404_v43  ;;  %v641_v30 = vsel %vm270_vm1, %v603_v17, 0.0  ;;  %v234_v31 = vpop.f32.mrf.mxu0  ;;  %v602_v33 = vmul.f32 %v1535_v21, %v1535_v21  ;;  %v492_v17 = vsel %vm270_vm1, %v468_v16, 0.0 }
  0xe5   :  { %621 = vadd.xlane.f32.xlu1 %v620_v40  ;;  %v445_v32 = vpop.f32.mrf.mxu1  ;;  %v1552_v36 = vadd.f32 %v1395_v38, %v234_v31  ;;  %v540_v40 = vmul.f32 %v1540_v25, %v1540_v25 }
  0xe6   :  { %v605_v41 = vmul.f32 %v1545_v29, %v1545_v29  ;;  %v638_v46 = vsel %vm270_vm1, %v602_v33, 0.0 }
  0xe7   :  { %v1122_v37 = vpop.f32.mrf.mxu1  ;;  %v580_v50 = vsel %vm270_vm1, %v540_v40, 0.0  ;;  %v542_v51 = vmul.f32 %v1552_v36, %v1552_v36 }
  0xe8   :  { %563 = vadd.xlane.f32.xlu0 %v562_v44  ;;  %v446_v44 = vadd.f32 %v1404_v43, %v445_v32  ;;  %v647_v52 = vsel %vm270_vm1, %v605_v41, 0.0  ;;  %v461_v0 = vadd.f32 %v1122_v37, %v1404_v43 }
  0xe9   :  { %630 = vadd.xlane.f32.xlu1 %v629_v49  ;;  %v455_v49 = vpop.f32.mrf.mxu1  ;;  %v586_v60 = vsel %vm270_vm1, %v542_v51, 0.0 }
  0xea   :  { %v456_v57 = vadd.f32 %v1404_v43, %v455_v49  ;;  %v604_v58 = vmul.f32 %v446_v44, %v446_v44  ;;  %v607_v9 = vmul.f32 %v461_v0, %v461_v0  ;;  %v466_v43 = vmul.f32 %v1439_v6, %v1415_v54 }
  0xeb   :  { %v470_v54 = vmul.f32 %v1487_v39, %v1468_v26  ;;  %v474_v26 = vmul.f32 %v1535_v21, %v1516_v4 }
  0xec   :  { %572 = vadd.xlane.f32.xlu0 %v571_v53  ;;  %v240_v53 = vadd.f32 %v1090_v19, %v1395_v38  ;;  %v644_v1 = vsel %vm270_vm1, %v604_v58, 0.0  ;;  %v464_v38 = vmul.f32 %v1420_v56, %v1399_v42  ;;  %v653_v13 = vsel %vm270_vm1, %v607_v9, 0.0 }
  0xed   :  { %627 = vadd.xlane.f32.xlu1 %v626_v63  ;;  %v483_v42 = vsel %vm270_vm1, %v1422_v59, 0.0  ;;  %v467_v56 = vmul.f32 %v1426_v62, %v1408_v48  ;;  %v469_v19 = vmul.f32 %v1449_v12, %v1432_v2  ;;  %v498_v10 = vsel %vm270_vm1, %v470_v54, 0.0 }
  0xee   :  { %v543_v63 = vmul.f32 %v240_v53, %v240_v53  ;;  %v480_v11 = vsel %vm270_vm1, %v464_v38, 0.0  ;;  %v472_v59 = vmul.f32 %v1511_v61, %v1492_v45  ;;  %v471_v62 = vmul.f32 %v1473_v28, %v1456_v18 }
  0xef   :  { %v489_v6 = vsel %vm270_vm1, %v467_v56, 0.0  ;;  %v495_v48 = vsel %vm270_vm1, %v469_v19, 0.0  ;;  %v473_v12 = vmul.f32 %v1497_v47, %v1480_v34  ;;  %v510_v39 = vsel %vm270_vm1, %v474_v26, 0.0 }
  0xf0   :  { %569 = vadd.xlane.f32.xlu0 %v568_v3  ;;  %v606_v3 = vmul.f32 %v456_v57, %v456_v57  ;;  %v589_v5 = vsel %vm270_vm1, %v543_v63, 0.0  ;;  %v504_v22 = vsel %vm270_vm1, %v472_v59, 0.0  ;;  %v501_v2 = vsel %vm270_vm1, %v471_v62, 0.0 }
  0xf1   :  { %636 = vadd.xlane.f32.xlu1 %v635_v8  ;;  %v476_v45 = vmul.f32 %v446_v44, %v1540_v25  ;;  %v507_v61 = vsel %vm270_vm1, %v473_v12, 0.0  ;;  %v475_v18 = vmul.f32 %v1521_v7, %v1504_v55  ;;  %v478_v4 = vmul.f32 %v456_v57, %v1552_v36 }
  0xf2   :  { %v650_v8 = vsel %vm270_vm1, %v606_v3, 0.0  ;;  %v477_v34 = vmul.f32 %v1545_v29, %v1528_v15 }
  0xf3   :  { %v516_v28 = vsel %vm270_vm1, %v476_v45, 0.0  ;;  %v513_v20 = vsel %vm270_vm1, %v475_v18, 0.0  ;;  %v522_v47 = vsel %vm270_vm1, %v478_v4, 0.0 }
  0xf4   :  { %578 = vadd.xlane.f32.xlu0 %v577_v14  ;;  %v486_v14 = vsel %vm270_vm1, %v466_v43, 0.0  ;;  %v519_v21 = vsel %vm270_vm1, %v477_v34, 0.0 }
  0xf5   :  { %633 = vadd.xlane.f32.xlu1 %v632_v23  ;;  %v479_v23 = vmul.f32 %v461_v0, %v240_v53 }
  0xf7   :  { %v525_v55 = vsel %vm270_vm1, %v479_v23, 0.0 }
  0xf8   :  { %575 = vadd.xlane.f32.xlu0 %v574_v24 }
  0xf9   :  { %642 = vadd.xlane.f32.xlu1 %v641_v30 }
  0xfc   :  { %584 = vadd.xlane.f32.xlu0 %v583_v35 }
  0xfd   :  { %639 = vadd.xlane.f32.xlu1 %v638_v46 }
 0x100   :  { %581 = vadd.xlane.f32.xlu0 %v580_v50 }
 0x101   :  { %648 = vadd.xlane.f32.xlu1 %v647_v52 }
 0x104   :  { %587 = vadd.xlane.f32.xlu0 %v586_v60 }
 0x105   :  { %645 = vadd.xlane.f32.xlu1 %v644_v1 }
 0x108   :  { %590 = vadd.xlane.f32.xlu0 %v589_v5 }
 0x109   :  { %651 = vadd.xlane.f32.xlu1 %v650_v8 }
 0x10c   :  { %481 = vadd.xlane.f32.xlu0 %v480_v11 }
 0x10d   :  { %654 = vadd.xlane.f32.xlu1 %v653_v13 }
 0x110   :  { %487 = vadd.xlane.f32.xlu0 %v486_v14 }
 0x111   :  { %484 = vadd.xlane.f32.xlu1 %v483_v42  ;;  %v864_v42 = vlaneseq }
 0x114   :  { %493 = vadd.xlane.f32.xlu0 %v492_v17 }
 0x115   :  { %490 = vadd.xlane.f32.xlu1 %v489_v6 }
 0x118   :  { %499 = vadd.xlane.f32.xlu0 %v498_v10  ;;  %v1637_v10 = vand.u32 127, %v864_v42 }
 0x119   :  { %496 = vadd.xlane.f32.xlu1 %v495_v48 }
 0x11a   :  { %v1646_v12 = vadd.s32 4294967280, %v1637_v10  ;;  %v1652_v18 = vadd.s32 4294967264, %v1637_v10 }
 0x11c   :  { %505 = vadd.xlane.f32.xlu0 %v504_v22  ;;  %v1639_v22 = vshrl.u32 %v864_v42, 7 }
 0x11d   :  { %502 = vadd.xlane.f32.xlu1 %v501_v2  ;;  %v1643_v2 = vadd.s32 4294967288, %v1637_v10 }
 0x120   :  { %511 = vadd.xlane.f32.xlu0 %v510_v39  ;;  %v1649_v39 = vadd.s32 4294967272, %v1637_v10 }
 0x121   :  { %508 = vadd.xlane.f32.xlu1 %v507_v61 }
 0x124   :  { %517 = vadd.xlane.f32.xlu0 %v516_v28  ;;  %v1655_v28 = vadd.s32 4294967256, %v1637_v10 }
 0x125   :  { %514 = vadd.xlane.f32.xlu1 %v513_v20  ;;  %v1659_v20 = vadd.s32 4294967248, %v1637_v10 }
 0x128   :  { %523 = vadd.xlane.f32.xlu0 %v522_v47 }
 0x129   :  { %520 = vadd.xlane.f32.xlu1 %v519_v21 }
 0x12d   :  { %526 = vadd.xlane.f32.xlu1 %v525_v55 }
 0x155   :  { %v549_v7 = vpop.xlane.xlu0 %548 }
 0x156   :  { %v657_v36 = vmax.f32 %v549_v7, 1e-12 }
 0x159   :  { %v546_v24 = vpop.xlane.xlu0 %545 }
 0x15a   :  { %v613_v25 = vpop.xlane.xlu1 %612  ;;  %v656_v51 = vmax.f32 %v546_v24, 1e-12  ;;  %v868_v24 = vsub.s32 %v1637_v10, %v1639_v22 }
 0x15b   :  { %v673_v37 = vmax.f32 %v613_v25, 1e-12  ;;  %v873_v25 = vsub.s32 %v1643_v2, %v1639_v22 }
 0x15d   :  { %v555_v27 = vpop.xlane.xlu0 %554  ;;  %v1615_v50 = vmul.f32 %v673_v37, %v657_v36  ;;  %v908_v36 = vsub.s32 %v1659_v20, %v1639_v22 }
 0x15e   :  { %v610_v30 = vpop.xlane.xlu1 %609  ;;  %v659_v44 = vmax.f32 %v555_v27, 1e-12  ;;  %v880_v27 = vsub.s32 %v1646_v12, %v1639_v22 }
 0x15f   :  { %v672_v40 = vmax.f32 %v610_v30, 1e-12  ;;  %1124 = vrsqrt.f32 %v1615_v50  ;;  %v887_v30 = vsub.s32 %v1649_v39, %v1639_v22  ;;  %vm713_vm2 = vcmp.eq.f32.partialorder %v1615_v50, inf }
 0x160   :  { %vm715_vm3 = vcmp.eq.f32.partialorder %v1615_v50, 0.0 }
 0x161   :  { %v552_v31 = vpop.xlane.xlu0 %551  ;;  %v1617_v53 = vmul.f32 %v672_v40, %v656_v51 }
 0x162   :  { %v619_v32 = vpop.xlane.xlu1 %618  ;;  %v658_v57 = vmax.f32 %v552_v31, 1e-12 }
 0x163   :  { %v675_v46 = vmax.f32 %v619_v32, 1e-12  ;;  %1126 = vrsqrt.f32 %v1617_v53  ;;  %vm706_vm4 = vcmp.eq.f32.partialorder %v1617_v53, inf  ;;  %vm708_vm5 = vcmp.eq.f32.partialorder %v1617_v53, 0.0 }
 0x164   :  { %v709_v51 = vand.u32 2147483648, %v1617_v53 }
 0x165   :  { %v561_v33 = vpop.xlane.xlu0 %560  ;;  %v1619_v60 = vmul.f32 %v675_v46, %v659_v44 }
 0x166   :  { %v616_v15 = vpop.xlane.xlu1 %615  ;;  %v661_v3 = vmax.f32 %v561_v33, 1e-12 }
 0x167   :  { %v674_v52 = vmax.f32 %v616_v15, 1e-12  ;;  %1128 = vrsqrt.f32 %v1619_v60  ;;  %v894_v15 = vsub.s32 %v1652_v18, %v1639_v22  ;;  %vm727_vm7 = vcmp.eq.f32.partialorder %v1619_v60, inf }
 0x168   :  { %vm729_vm8 = vcmp.eq.f32.partialorder %v1619_v60, 0.0 }
 0x169   :  { %v558_v29 = vpop.xlane.xlu0 %557  ;;  %v1622_v0 = vmul.f32 %v674_v52, %v658_v57 }
 0x16a   :  { %v625_v35 = vpop.xlane.xlu1 %624  ;;  %v660_v38 = vmax.f32 %v558_v29, 1e-12  ;;  %v901_v29 = vsub.s32 %v1655_v28, %v1639_v22 }
 0x16b   :  { %v677_v5 = vmax.f32 %v625_v35, 1e-12  ;;  %1130 = vrsqrt.f32 %v1622_v0  ;;  %vm720_vm6 = vcmp.eq.f32.partialorder %v1622_v0, inf  ;;  %vm722_vm9 = vcmp.eq.f32.partialorder %v1622_v0, 0.0 }
 0x16c   :  { %v1125_v4 = vpop.eup %1124  ;;  %v723_v42 = vand.u32 2147483648, %v1622_v0 }
 0x16d   :  { %v567_v41 = vpop.xlane.xlu0 %566  ;;  %v1629_v14 = vmul.f32 %v677_v5, %v661_v3  ;;  %v712_v32 = vmul.f32 %v1125_v4, %v1615_v50  ;;  %v730_v3 = vand.u32 2147483648, %v1619_v60 }
 0x16e   :  { %v622_v49 = vpop.xlane.xlu1 %621  ;;  %v663_v9 = vmax.f32 %v567_v41, 1e-12  ;;  %v716_v41 = vand.u32 2147483648, %v1615_v50 }
 0x16f   :  { %v676_v1 = vmax.f32 %v622_v49, 1e-12  ;;  %vm741_vm10 = vcmp.eq.f32.partialorder %v1629_v14, inf  ;;  %vm743_vm11 = vcmp.eq.f32.partialorder %v1629_v14, 0.0 }
 0x170   :  { %v1127_v55 = vpop.eup %1126 }
 0x171   :  { %v564_v58 = vpop.xlane.xlu0 %563  ;;  %v1627_v13 = vmul.f32 %v676_v1, %v660_v38  ;;  %v705_v44 = vmul.f32 %v1127_v55, %v1617_v53 }
 0x172   :  { %v631_v63 = vpop.xlane.xlu1 %630  ;;  %v662_v54 = vmax.f32 %v564_v58, 1e-12 }
 0x173   :  { %v679_v11 = vmax.f32 %v631_v63, 1e-12  ;;  %1132 = vrsqrt.f32 %v1627_v13  ;;  %v714_v63 = vsel %vm713_vm2, %v1615_v50, %v712_v32  ;;  %v744_v50 = vand.u32 2147483648, %v1629_v14 }
 0x174   :  { %1134 = vrsqrt.f32 %v1629_v14  ;;  %v1129_v31 = vpop.eup %1128  ;;  %vm734_vm12 = vcmp.eq.f32.partialorder %v1627_v13, inf  ;;  %vm736_vm13 = vcmp.eq.f32.partialorder %v1627_v13, 0.0 }
 0x175   :  { %v573_v8 = vpop.xlane.xlu0 %572  ;;  %v1631_v17 = vmul.f32 %v679_v11, %v663_v9  ;;  %v726_v46 = vmul.f32 %v1129_v31, %v1619_v60 }
 0x176   :  { %v628_v43 = vpop.xlane.xlu1 %627  ;;  %v665_v59 = vmax.f32 %v573_v8, 1e-12 }
 0x177   :  { %v678_v16 = vmax.f32 %v628_v43, 1e-12  ;;  %1136 = vrsqrt.f32 %v1631_v17  ;;  %v707_v43 = vsel %vm706_vm4, %v1617_v53, %v705_v44  ;;  %vm755_vm14 = vcmp.eq.f32.partialorder %v1631_v17, inf }
 0x178   :  { %v1131_v35 = vpop.eup %1130  ;;  %v710_v4 = vsel %vm708_vm5, %v709_v51, %v707_v43  ;;  %v758_v44 = vand.u32 2147483648, %v1631_v17  ;;  %vm757_vm0 = vcmp.eq.f32.partialorder %v1631_v17, 0.0  ;;  %vm875_vm5 = vcmask 130112  }
 0x179   :  { %v570_v56 = vpop.xlane.xlu0 %569  ;;  %v1635_v19 = vmul.f32 %v678_v16, %v662_v54  ;;  %v719_v52 = vmul.f32 %v1131_v35, %v1622_v0  ;;  %v717_v16 = vsel %vm715_vm3, %v716_v41, %v714_v63  ;;  %v737_v35 = vand.u32 2147483648, %v1627_v13 }
 0x17a   :  { %v637_v6 = vpop.xlane.xlu1 %636  ;;  %v664_v45 = vmax.f32 %v570_v56, 1e-12  ;;  %v728_v56 = vsel %vm727_vm7, %v1619_v60, %v726_v46 }
 0x17b   :  { %v681_v48 = vmax.f32 %v637_v6, 1e-12  ;;  %1138 = vrsqrt.f32 %v1635_v19  ;;  %vm748_vm15 = vcmp.eq.f32.partialorder %v1635_v19, inf  ;;  %vm750_vm1 = vcmp.eq.f32.partialorder %v1635_v19, 0.0 }
 0x17d   :  { %v579_v62 = vpop.xlane.xlu0 %578  ;;  %v1661_v34 = vmul.f32 %v681_v48, %v665_v59  ;;  %v721_v48 = vsel %vm720_vm6, %v1622_v0, %v719_v52 }
 0x17e   :  { %v634_v26 = vpop.xlane.xlu1 %633  ;;  %v667_v21 = vmax.f32 %v579_v62, 1e-12  ;;  %v724_v55 = vsel %vm722_vm9, %v723_v42, %v721_v48 }
 0x17f   :  { %v680_v61 = vmax.f32 %v634_v26, 1e-12  ;;  %vm769_vm3 = vcmp.eq.f32.partialorder %v1661_v34, inf  ;;  %vm771_vm4 = vcmp.eq.f32.partialorder %v1661_v34, 0.0 }
 0x180   :  { %v1133_v1 = vpop.eup %1132 }
 0x181   :  { %v1663_v47 = vmul.f32 %v680_v61, %v664_v45  ;;  %v576_v23 = vpop.xlane.xlu0 %575  ;;  %v1135_v5 = vpop.eup %1134  ;;  %v733_v6 = vmul.f32 %v1133_v1, %v1627_v13 }
 0x182   :  { %v643_v7 = vpop.xlane.xlu1 %642  ;;  %v666_v57 = vmax.f32 %v576_v23, 1e-12  ;;  %v740_v62 = vmul.f32 %v1135_v5, %v1629_v14  ;;  %v751_v5 = vand.u32 2147483648, %v1635_v19 }
 0x183   :  { %v683_v33 = vmax.f32 %v643_v7, 1e-12  ;;  %1140 = vrsqrt.f32 %v1663_v47  ;;  %v731_v7 = vsel %vm729_vm8, %v730_v3, %v728_v56  ;;  %v735_v53 = vsel %vm734_vm12, %v1627_v13, %v733_v6 }
 0x184   :  { %1142 = vrsqrt.f32 %v1661_v34  ;;  %v1137_v54 = vpop.eup %1136  ;;  %v742_v0 = vsel %vm741_vm10, %v1629_v14, %v740_v62  ;;  %v738_v51 = vsel %vm736_vm13, %v737_v35, %v735_v53  ;;  %vm762_vm2 = vcmp.eq.f32.partialorder %v1663_v47, inf }
 0x185   :  { %v1684_v37 = vmul.f32 %v683_v33, %v667_v21  ;;  %v585_v40 = vpop.xlane.xlu0 %584  ;;  %v754_v21 = vmul.f32 %v1137_v54, %v1631_v17  ;;  %v745_v63 = vsel %vm743_vm11, %v744_v50, %v742_v0  ;;  %v765_v6 = vand.u32 2147483648, %v1663_v47 }
 0x186   :  { %v640_v49 = vpop.xlane.xlu1 %639  ;;  %v669_v8 = vmax.f32 %v585_v40, 1e-12  ;;  %vm764_vm6 = vcmp.eq.f32.partialorder %v1663_v47, 0.0  ;;  %vm882_vm8 = vcmask 195712   ;;  %vm889_vm11 = vcmask 261312  }
 0x187   :  { %v682_v58 = vmax.f32 %v640_v49, 1e-12  ;;  %1144 = vrsqrt.f32 %v1684_v37  ;;  %v756_v52 = vsel %vm755_vm14, %v1631_v17, %v754_v21  ;;  %vm783_vm10 = vcmp.eq.f32.partialorder %v1684_v37, inf }
 0x188   :  { %v1139_v26 = vpop.eup %1138  ;;  %v1780_v35 = vadd.s32 4294967240, %v1637_v10  ;;  %vm785_vm12 = vcmp.eq.f32.partialorder %v1684_v37, 0.0  ;;  %vm896_vm14 = vcmask 326912  }
 0x189   :  { %v1701_v38 = vmul.f32 %v682_v58, %v666_v57  ;;  %v582_v9 = vpop.xlane.xlu0 %581  ;;  %v747_v33 = vmul.f32 %v1139_v26, %v1635_v19 }
 0x18a   :  { %v649_v11 = vpop.xlane.xlu1 %648  ;;  %v668_v31 = vmax.f32 %v582_v9, 1e-12 }
 0x18b   :  { %1146 = vrsqrt.f32 %v1701_v38  ;;  %v685_v59 = vmax.f32 %v649_v11, 1e-12  ;;  %v749_v3 = vsel %vm748_vm15, %v1635_v19, %v747_v33  ;;  %v759_v11 = vsel %vm757_vm0, %v758_v44, %v756_v52 }
 0x18c   :  { %1148 = vrcp.f32 %v717_v16  ;;  %v752_v42 = vsel %vm750_vm1, %v751_v5, %v749_v3  ;;  %vm776_vm7 = vcmp.eq.f32.partialorder %v1701_v38, inf  ;;  %vm778_vm9 = vcmp.eq.f32.partialorder %v1701_v38, 0.0 }
 0x18d   :  { %v1720_v45 = vmul.f32 %v685_v59, %v669_v8  ;;  %v588_v61 = vpop.xlane.xlu0 %587  ;;  %vm903_vm0 = vcmask 392512  }
 0x18e   :  { %v646_v23 = vpop.xlane.xlu1 %645  ;;  %v670_v57 = vmax.f32 %v588_v61, 1e-12 }
 0x18f   :  { %1150 = vrsqrt.f32 %v1720_v45  ;;  %v684_v32 = vmax.f32 %v646_v23, 1e-12  ;;  %vm797_vm13 = vcmp.eq.f32.partialorder %v1720_v45, inf  ;;  %vm799_vm15 = vcmp.eq.f32.partialorder %v1720_v45, 0.0 }
 0x190   :  { %1152 = vrcp.f32 %v710_v4  ;;  %v1141_v40 = vpop.eup %1140  ;;  %v772_v4 = vand.u32 2147483648, %v1661_v34 }
 0x191   :  { %v1738_v60 = vmul.f32 %v684_v32, %v668_v31  ;;  %v591_v41 = vpop.xlane.xlu0 %590  ;;  %1154 = vrcp.f32 %v724_v55  ;;  %v1143_v46 = vpop.eup %1142  ;;  %v761_v1 = vmul.f32 %v1141_v40, %v1663_v47  ;;  %v779_v55 = vand.u32 2147483648, %v1701_v38 }
 0x192   :  { %v652_v49 = vpop.xlane.xlu1 %651  ;;  %1156 = vrcp.f32 %v731_v7  ;;  %v768_v13 = vmul.f32 %v1143_v46, %v1661_v34  ;;  %v671_v14 = vmax.f32 %v591_v41, 1e-12 }
 0x193   :  { %1158 = vrsqrt.f32 %v1738_v60  ;;  %v686_v58 = vmax.f32 %v652_v49, 1e-12  ;;  %v763_v54 = vsel %vm762_vm2, %v1663_v47, %v761_v1  ;;  %vm790_vm1 = vcmp.eq.f32.partialorder %v1738_v60, inf }
 0x194   :  { %1160 = vrcp.f32 %v738_v51  ;;  %v1145_v43 = vpop.eup %1144  ;;  %v770_v50 = vsel %vm769_vm3, %v1661_v34, %v768_v13  ;;  %v766_v21 = vsel %vm764_vm6, %v765_v6, %v763_v54  ;;  %v1784_v34 = vadd.s32 4294967232, %v1637_v10 }
 0x195   :  { %v1754_v8 = vmul.f32 %v686_v58, %v670_v57  ;;  %v482_v9 = vpop.xlane.xlu0 %481  ;;  %1162 = vrcp.f32 %v745_v63  ;;  %v782_v59 = vmul.f32 %v1145_v43, %v1684_v37  ;;  %v773_v32 = vsel %vm771_vm4, %v772_v4, %v770_v50 }
 0x196   :  { %v655_v16 = vpop.xlane.xlu1 %654  ;;  %vm792_vm2 = vcmp.eq.f32.partialorder %v1738_v60, 0.0  ;;  %vm910_vm3 = vcmask 458112  }
 0x197   :  { %1164 = vrsqrt.f32 %v1754_v8  ;;  %v687_v17 = vmax.f32 %v655_v16, 1e-12  ;;  %v784_v40 = vsel %vm783_vm10, %v1684_v37, %v782_v59  ;;  %vm804_vm4 = vcmp.eq.f32.partialorder %v1754_v8, inf }
 0x198   :  { %v1147_v56 = vpop.eup %1146  ;;  %1166 = vrcp.f32 %v759_v11  ;;  %v807_v39 = vand.u32 2147483648, %v1754_v8  ;;  %vm931_vm10 = vcmask 654912  }
 0x199   :  { %v775_v19 = vmul.f32 %v1147_v56, %v1701_v38  ;;  %v1765_v48 = vmul.f32 %v687_v17, %v671_v14  ;;  %v488_v62 = vpop.xlane.xlu0 %487  ;;  %v1149_v26 = vpop.eup %1148  ;;  %1168 = vrcp.f32 %v752_v42 }
 0x19a   :  { %v485_v61 = vpop.xlane.xlu1 %484 }
 0x19b   :  { %1170 = vrsqrt.f32 %v1765_v48  ;;  %v777_v23 = vsel %vm776_vm7, %v1701_v38, %v775_v19  ;;  %v819_v31 = vmul.f32 %v1149_v26, %v485_v61  ;;  %v786_v38 = vand.u32 2147483648, %v1684_v37 }
 0x19c   :  { %v1151_v7 = vpop.eup %1150  ;;  %v780_v0 = vsel %vm778_vm9, %v779_v55, %v777_v23  ;;  %1172 = vrcp.f32 %v766_v21  ;;  %v800_v37 = vand.u32 2147483648, %v1720_v45  ;;  %vm811_vm6 = vcmp.eq.f32.partialorder %v1765_v48, inf }
 0x19d   :  { %v1153_v47 = vpop.eup %1152  ;;  %v796_v53 = vmul.f32 %v1151_v7, %v1720_v45  ;;  %v494_v33 = vpop.xlane.xlu0 %493  ;;  %1174 = vrcp.f32 %v773_v32  ;;  %v874_v57 = vrot.slane %v819_v31, %v873_v25  ;;  %v787_v63 = vsel %vm785_vm12, %v786_v38, %v784_v40 }
 0x19e   :  { %v1155_v41 = vpop.eup %1154  ;;  %v817_v44 = vmul.f32 %v1153_v47, %v482_v9  ;;  %v491_v46 = vpop.xlane.xlu1 %490  ;;  %1176 = vrcp.f32 %v780_v0  ;;  %v793_v25 = vand.u32 2147483648, %v1738_v60  ;;  %v933_v47 = vadd.s32 4294967216, %v1637_v10 }
 0x19f   :  { %v1157_v49 = vpop.eup %1156  ;;  %v821_v51 = vmul.f32 %v1155_v41, %v488_v62  ;;  %v798_v5 = vsel %vm797_vm13, %v1720_v45, %v796_v53  ;;  %1178 = vrcp.f32 %v787_v63  ;;  %v926_v62 = vadd.s32 4294967224, %v1637_v10 }
 0x1a0   :  { %v1159_v52 = vpop.eup %1158  ;;  %v823_v58 = vmul.f32 %v1157_v49, %v491_v46  ;;  %v869_v9 = vrot.slane %v817_v44, %v868_v24  ;;  %v801_v54 = vsel %vm799_vm15, %v800_v37, %v798_v5  ;;  %v814_v18 = vand.u32 2147483648, %v1765_v48 }
 0x1a1   :  { %v789_v1 = vmul.f32 %v1159_v52, %v1738_v60  ;;  %v500_v3 = vpop.xlane.xlu0 %499  ;;  %v1161_v13 = vpop.eup %1160  ;;  %v881_v43 = vrot.slane %v821_v51, %v880_v27  ;;  %vm813_vm7 = vcmp.eq.f32.partialorder %v1765_v48, 0.0  ;;  %v947_v52 = vadd.s32 4294967200, %v1637_v10 }
 0x1a2   :  { %v497_v2 = vpop.xlane.xlu1 %496  ;;  %v1163_v11 = vpop.eup %1162  ;;  %v825_v16 = vmul.f32 %v1161_v13, %v494_v33  ;;  %v876_v24 = vsel %vm875_vm5, %v874_v57, %v869_v9  ;;  %v888_v42 = vrot.slane %v823_v58, %v887_v30  ;;  %vm806_vm5 = vcmp.eq.f32.partialorder %v1754_v8, 0.0 }
 0x1a3   :  { %v791_v14 = vsel %vm790_vm1, %v1738_v60, %v789_v1  ;;  %v827_v12 = vmul.f32 %v1163_v11, %v497_v2  ;;  %v915_v60 = vsub.s32 %v1780_v35, %v1639_v22  ;;  %v883_v45 = vsel %vm882_vm8, %v881_v43, %v876_v24 }
 0x1a4   :  { %v1165_v17 = vpop.eup %1164  ;;  %v794_v56 = vsel %vm792_vm2, %v793_v25, %v791_v14  ;;  %v890_v61 = vsel %vm889_vm11, %v888_v42, %v883_v45  ;;  %v895_v4 = vrot.slane %v825_v16, %v894_v15  ;;  %v929_v33 = vsub.s32 %v926_v62, %v1639_v22 }
 0x1a5   :  { %v1167_v6 = vpop.eup %1166  ;;  %v803_v59 = vmul.f32 %v1165_v17, %v1754_v8  ;;  %v506_v27 = vpop.xlane.xlu0 %505  ;;  %1180 = vrcp.f32 %v794_v56  ;;  %v902_v7 = vrot.slane %v827_v12, %v901_v29  ;;  %v940_v35 = vadd.s32 4294967208, %v1637_v10 }
 0x1a6   :  { %v503_v19 = vpop.xlane.xlu1 %502  ;;  %v1169_v30 = vpop.eup %1168  ;;  %1182 = vrcp.f32 %v801_v54  ;;  %v897_v0 = vsel %vm896_vm14, %v895_v4, %v890_v61  ;;  %vm917_vm8 = vcmask 523712   ;;  %vm924_vm9 = vcmask 589312  }
 0x1a7   :  { %v805_v50 = vsel %vm804_vm4, %v1754_v8, %v803_v59  ;;  %v829_v21 = vmul.f32 %v1169_v30, %v500_v3  ;;  %v831_v31 = vmul.f32 %v1167_v6, %v503_v19  ;;  %v922_v8 = vsub.s32 %v1784_v34, %v1639_v22 }
 0x1a8   :  { %v1171_v26 = vpop.eup %1170  ;;  %v808_v23 = vsel %vm806_vm5, %v807_v39, %v805_v50  ;;  %v904_v34 = vsel %vm903_vm0, %v902_v7, %v897_v0  ;;  %v954_v1 = vadd.s32 4294967192, %v1637_v10  ;;  %v943_v37 = vsub.s32 %v940_v35, %v1639_v22 }
 0x1a9   :  { %v810_v55 = vmul.f32 %v1171_v26, %v1765_v48  ;;  %1184 = vrcp.f32 %v808_v23  ;;  %v512_v53 = vpop.xlane.xlu0 %511  ;;  %v1173_v15 = vpop.eup %1172  ;;  %v909_v40 = vrot.slane %v829_v21, %v908_v36  ;;  %v916_v38 = vrot.slane %v831_v31, %v915_v60 }
 0x1aa   :  { %v509_v32 = vpop.xlane.xlu1 %508  ;;  %v1175_v29 = vpop.eup %1174  ;;  %v833_v41 = vmul.f32 %v1173_v15, %v506_v27  ;;  %v950_v2 = vsub.s32 %v947_v52, %v1639_v22  ;;  %v961_v11 = vadd.s32 4294967184, %v1637_v10  ;;  %vm938_vm11 = vcmask 720512  }
 0x1ab   :  { %v812_v28 = vsel %vm811_vm6, %v1765_v48, %v810_v55  ;;  %v1177_v46 = vpop.eup %1176  ;;  %v835_v49 = vmul.f32 %v1175_v29, %v509_v32  ;;  %v936_v48 = vsub.s32 %v933_v47, %v1639_v22  ;;  %v911_v58 = vsel %vm910_vm3, %v909_v40, %v904_v34 }
 0x1ac   :  { %v815_v44 = vsel %vm813_vm7, %v814_v18, %v812_v28  ;;  %v1179_v57 = vpop.eup %1178  ;;  %v923_v20 = vrot.slane %v833_v41, %v922_v8  ;;  %v837_v36 = vmul.f32 %v1177_v46, %v512_v53  ;;  %v918_v3 = vsel %vm917_vm8, %v916_v38, %v911_v58 }
 0x1ad   :  { %1186 = vrcp.f32 %v815_v44  ;;  %v518_v63 = vpop.xlane.xlu0 %517  ;;  %v930_v5 = vrot.slane %v835_v49, %v929_v33  ;;  %v957_v24 = vsub.s32 %v954_v1, %v1639_v22  ;;  %v968_v6 = vadd.s32 4294967176, %v1637_v10 }
 0x1ae   :  { %v515_v51 = vpop.xlane.xlu1 %514  ;;  %v925_v14 = vsel %vm924_vm9, %v923_v20, %v918_v3  ;;  %v937_v17 = vrot.slane %v837_v36, %v936_v48  ;;  %vm945_vm12 = vcmask 786112   ;;  %v964_v27 = vsub.s32 %v961_v11, %v1639_v22 }
 0x1af   :  { %v839_v13 = vmul.f32 %v1179_v57, %v515_v51  ;;  %v932_v42 = vsel %vm931_vm10, %v930_v5, %v925_v14  ;;  %vm952_vm13 = vcmask 851712   ;;  %v971_v45 = vsub.s32 %v968_v6, %v1639_v22 }
 0x1b0   :  { %v939_v62 = vsel %vm938_vm11, %v937_v17, %v932_v42  ;;  %vm959_vm14 = vcmask 917312   ;;  %vm966_vm15 = vcmask 982912   ;;  %vm973_vm0 = vcmask 1048512  }
 0x1b1   :  { %v944_v56 = vrot.slane %v839_v13, %v943_v37  ;;  %v524_v60 = vpop.xlane.xlu0 %523 }
 0x1b2   :  { %v1181_v9 = vpop.eup %1180  ;;  %v521_v25 = vpop.xlane.xlu1 %520 }
 0x1b3   :  { %v841_v43 = vmul.f32 %v1181_v9, %v518_v63  ;;  %v1183_v16 = vpop.eup %1182  ;;  %v946_v39 = vsel %vm945_vm12, %v944_v56, %v939_v62 }
 0x1b4   :  { %v843_v54 = vmul.f32 %v1183_v16, %v521_v25 }
 0x1b5   :  { %v951_v12 = vrot.slane %v841_v43, %v950_v2 }
 0x1b6   :  { %v1185_v59 = vpop.eup %1184  ;;  %v958_v30 = vrot.slane %v843_v54, %v957_v24  ;;  %v527_v4 = vpop.xlane.xlu1 %526 }
 0x1b7   :  { %v845_v19 = vmul.f32 %v1185_v59, %v524_v60  ;;  %v953_v26 = vsel %vm952_vm13, %v951_v12, %v946_v39 }
 0x1b8   :  { %v960_v23 = vsel %vm959_vm14, %v958_v30, %v953_v26 }
 0x1b9   :  { %v965_v61 = vrot.slane %v845_v19, %v964_v27 }
 0x1ba   :  { %v1187_v50 = vpop.eup %1186 }
 0x1bb   :  { %v847_v21 = vmul.f32 %v1187_v50, %v527_v4  ;;  %v967_v55 = vsel %vm966_vm15, %v965_v61, %v960_v23 }
 0x1bd   :  { %v972_v10 = vrot.slane %v847_v21, %v971_v45 }
 0x1bf   :  { %v974_v7 = vsel %vm973_vm0, %v972_v10, %v967_v55 }
 0x1c0   :  { %976 = vst [vmem:[#allocation2] sm:$0x1] %v974_v7 }
 0x1c1   :  { %1199 = shalt.err (!%p1196_p4)
}
 0x1c2   :  { %986 = dma.vmem_to_hbm [thread:$0]  %s984_s3, 16, %s1864_s6, [#allocation3]  }
 0x1c3   :  { %1208 = dma.done.wait [#allocation3], 16  }
 0x1c4   :  { %1209 = vsyncadd [#allocation3], 4294967280 }
 0x1c5   :  { %990 = vsyncpa [#allocation3], 1 }

</bundles_post_ra>
